<compile_context>
chip_gen: v7x
topology: tpu7x:2x2x1
jax: 0.10.0
libtpu: 0.0.40
codegen_flags: <defaults>
</compile_context>

<pallas_src>
import jax
import jax.numpy as jnp
from jax.experimental import pallas as pl
from jax.experimental.pallas import tpu as pltpu


def _round_up(x, m):
    return ((x + m - 1) // m) * m


def _cdiv(a, b):
    return -(-a // b)


def _choose_tiling(rows, max_tile_rows):
    """Pick (tile_rows, n_outer, n_inner, rows_padded) for a [rows, 128] slab."""
    # tile rows: multiple of 8, capped by max_tile_rows, never bigger than needed
    tr = min(max_tile_rows, _round_up(rows, 8))
    tr = _round_up(tr, 8)
    n_blocks = _cdiv(rows, tr)
    # split across 2 TensorCores when there is more than one block (wins on v7x,
    # harmless sequential iteration on v5e/v6e)
    n_outer = 2 if n_blocks >= 2 else 1
    n_inner = _cdiv(n_blocks, n_outer)
    rows_padded = n_outer * n_inner * tr
    return tr, n_outer, n_inner, rows_padded


def _content_loss_kernel(weight):
    """Kernel closure with a compile-time scalar weight."""

    def kernel(x_ref, t_ref, part_ref, acc_ref):
        i = pl.program_id(1)

        @pl.when(i == 0)
        def _():
            acc_ref[...] = jnp.zeros_like(acc_ref)

        # sum((x * weight - target)^2), accumulated into a vreg-shaped (8,128) partial.
        diff = x_ref[...].astype(jnp.float32) * weight - t_ref[...].astype(jnp.float32)
        sq = diff * diff
        # fold the (tr,128) tile into (8,128) with VPU adds only (no per-step XLU reduce)
        acc_ref[...] += sq.reshape(-1, 8, 128).sum(axis=0)

        @pl.when(i == pl.num_programs(1) - 1)
        def _():
            part_ref[0] = acc_ref[...]

    return kernel


def content_loss_forward(x, target_scaled, weight, *, max_tile_rows=1024):
    """Returns (out, loss) matching Content_Loss.forward.

    x:             input feature map, any shape / dtype
    target_scaled: target.detach() * weight, same shape as x
    weight:        python float (compile-time constant)
    """
    assert max_tile_rows % 8 == 0
    total = int(x.size)

    xf = x.reshape(-1)
    tf = target_scaled.reshape(-1)

    rows = _cdiv(total, 128)
    tr, n_outer, n_inner, rows_padded = _choose_tiling(rows, max_tile_rows)
    padded_total = rows_padded * 128

    pad = padded_total - total
    if pad:
        # zero padding on both operands -> diff == 0 in the padded tail, contributes nothing
        xf = jnp.pad(xf, (0, pad))
        tf = jnp.pad(tf, (0, pad))

    x2 = xf.reshape(rows_padded, 128)
    t2 = tf.reshape(rows_padded, 128)

    kernel = _content_loss_kernel(float(weight))

    partials = pl.pallas_call(
        kernel,
        out_shape=jax.ShapeDtypeStruct((n_outer, 8, 128), jnp.float32),
        grid_spec=pltpu.PrefetchScalarGridSpec(
            num_scalar_prefetch=0,
            grid=(n_outer, n_inner),
            in_specs=[
                pl.BlockSpec((tr, 128), lambda o, i: (o * n_inner + i, 0)),
                pl.BlockSpec((tr, 128), lambda o, i: (o * n_inner + i, 0)),
            ],
            out_specs=pl.BlockSpec((1, 8, 128), lambda o, i: (o, 0, 0)),
            scratch_shapes=[pltpu.VMEM((8, 128), jnp.float32)],
        ),
        compiler_params=pltpu.CompilerParams(
            # outer axis shards across TensorCores (v7x); inner axis carries the accumulator
            dimension_semantics=("parallel", "arbitrary"),
            vmem_limit_bytes=32 * 1024 * 1024,  # safe on v5e/v6e/v7x; tiles use ~2 MiB
        ),
    )(x2, t2)

    # final tiny reduction + hoisted divide (multiply by reciprocal of true element count)
    loss = partials.sum() * (1.0 / float(total))

    # out = input.clone() -> identity for immutable JAX arrays; no extra HBM traffic
    return x, loss


class ContentLoss:
    """JAX/Pallas equivalent of the PyTorch Content_Loss module (forward pass)."""

    def __init__(self, target, weight):
        self.weight = float(weight)
        # target.detach() * weight  (plain-JAX glue)
        self.target = jax.lax.stop_gradient(target) * self.weight
        self.loss = None

    def forward(self, x):
        out, loss = content_loss_forward(x, self.target, self.weight)
        self.loss = loss
        return out

    # TODO(synk): backward() (autograd .backward on self.loss) has no direct Pallas
    # equivalent here; gradients would come from jax.grad over the loss in a JAX training loop.


if __name__ == "__main__":
    key = jax.random.PRNGKey(0)
    k1, k2 = jax.random.split(key)

    # layout: NCHW, matching PyTorch conv feature maps
    N, C, H, W = 2, 4, 16, 16
    content_feat = jax.random.uniform(k1, (N, C, H, W), dtype=jnp.float32)
    input_feat = jax.random.uniform(k2, (N, C, H, W), dtype=jnp.float32)
    weight = 1.0

    module = ContentLoss(content_feat, weight)
    out = module.forward(input_feat)
    out = jax.block_until_ready(out)
    loss = jax.block_until_ready(module.loss)

    # sanity check against pure-JAX reference
    ref_loss = jnp.mean((input_feat * weight - content_feat * weight) ** 2)
    assert jnp.allclose(out, input_feat), "passthrough mismatch"
    assert jnp.allclose(loss, ref_loss, rtol=1e-5, atol=1e-6), "loss mismatch"

    # also exercise a shape that is NOT a multiple of 128 elements (padding path)
    odd = jax.random.uniform(k1, (1, 3, 7, 5), dtype=jnp.float32)
    odd_in = jax.random.uniform(k2, (1, 3, 7, 5), dtype=jnp.float32)
    m2 = ContentLoss(odd, 2.5)
    o2 = jax.block_until_ready(m2.forward(odd_in))
    l2 = jax.block_until_ready(m2.loss)
    ref2 = jnp.mean((odd_in * 2.5 - odd * 2.5) ** 2)
    assert jnp.allclose(o2, odd_in), "passthrough mismatch (padded path)"
    assert jnp.allclose(l2, ref2, rtol=1e-5, atol=1e-6), "loss mismatch (padded path)"

    print("KERNEL_OK")
</pallas_src>

<mosaic_0001>
module attributes {stable_mosaic.version = 11 : i64} {
  func.func @kernel(%arg0: i32, %arg1: i32, %arg2: memref<16x128xf32, #tpu.memory_space<vmem>>, %arg3: memref<16x128xf32, #tpu.memory_space<vmem>>, %arg4: memref<1x8x128xf32, #tpu.memory_space<vmem>>, %arg5: memref<8x128xf32, #tpu.memory_space<vmem>>) attributes {dimension_semantics = [#tpu.dimension_semantics<parallel>, #tpu.dimension_semantics<arbitrary>], iteration_bounds = array<i64: 1, 1>, scalar_prefetch = 0 : i64, scratch_operands = 1 : i64, tpu.core_type = #tpu.core_type<tc>, window_params = [{transform_indices = @transform_0, window_bounds = array<i64: 16, 128>}, {transform_indices = @transform_1, window_bounds = array<i64: 16, 128>}, {transform_indices = @transform_2, window_bounds = array<i64: 1, 8, 128>}]} {
    %c0_i32 = arith.constant 0 : i32
    %0 = arith.cmpi eq, %arg1, %c0_i32 : i32
    %1 = arith.extui %0 : i1 to i32
    %c0_i32_0 = arith.constant 0 : i32
    %2 = arith.cmpi ne, %1, %c0_i32_0 : i32
    scf.if %2 {
      %cst_11 = arith.constant 0.000000e+00 : f32
      %17 = vector.broadcast %cst_11 : f32 to vector<8x128xf32>
      %c0_12 = arith.constant 0 : index
      %c0_13 = arith.constant 0 : index
      %18 = vector.load %arg5[%c0_12, %c0_13] : memref<8x128xf32, #tpu.memory_space<vmem>>, vector<8x128xf32>
      tpu.vector_store %arg5[%c0_12, %c0_13], %17 {strides = array<i32>} : memref<8x128xf32, #tpu.memory_space<vmem>>, vector<8x128xf32>,
    } else {
    }
    %c0 = arith.constant 0 : index
    %c0_1 = arith.constant 0 : index
    %3 = vector.load %arg2[%c0, %c0_1] : memref<16x128xf32, #tpu.memory_space<vmem>>, vector<16x128xf32>
    %cst = arith.constant 1.000000e+00 : f32
    %4 = vector.broadcast %cst : f32 to vector<16x128xf32>
    %5 = arith.mulf %3, %4 : vector<16x128xf32>
    %c0_2 = arith.constant 0 : index
    %c0_3 = arith.constant 0 : index
    %6 = vector.load %arg3[%c0_2, %c0_3] : memref<16x128xf32, #tpu.memory_space<vmem>>, vector<16x128xf32>
    %7 = arith.subf %5, %6 : vector<16x128xf32>
    %8 = arith.mulf %7, %7 : vector<16x128xf32>
    %c0_4 = arith.constant 0 : index
    %c0_5 = arith.constant 0 : index
    %9 = vector.load %arg5[%c0_4, %c0_5] : memref<8x128xf32, #tpu.memory_space<vmem>>, vector<8x128xf32>
    %10 = vector.shape_cast %8 : vector<16x128xf32> to vector<2x8x128xf32>
    %cst_6 = arith.constant dense<0.000000e+00> : vector<8x128xf32>
    %11 = vector.multi_reduction <add>, %10, %cst_6 [0] : vector<2x8x128xf32> to vector<8x128xf32>
    %12 = arith.addf %9, %11 : vector<8x128xf32>
    %c0_7 = arith.constant 0 : index
    %c0_8 = arith.constant 0 : index
    %13 = vector.load %arg5[%c0_7, %c0_8] : memref<8x128xf32, #tpu.memory_space<vmem>>, vector<8x128xf32>
    tpu.vector_store %arg5[%c0_7, %c0_8], %12 {strides = array<i32>} : memref<8x128xf32, #tpu.memory_space<vmem>>, vector<8x128xf32>,
    %c0_i32_9 = arith.constant 0 : i32
    %14 = arith.cmpi eq, %arg1, %c0_i32_9 : i32
    %15 = arith.extui %14 : i1 to i32
    %c0_i32_10 = arith.constant 0 : i32
    %16 = arith.cmpi ne, %15, %c0_i32_10 : i32
    scf.if %16 {
      %c0_11 = arith.constant 0 : index
      %c0_12 = arith.constant 0 : index
      %17 = vector.load %arg5[%c0_11, %c0_12] : memref<8x128xf32, #tpu.memory_space<vmem>>, vector<8x128xf32>
      %c0_13 = arith.constant 0 : index
      %c0_14 = arith.constant 0 : index
      %c0_15 = arith.constant 0 : index
      %18 = vector.load %arg4[%c0_13, %c0_14, %c0_15] : memref<1x8x128xf32, #tpu.memory_space<vmem>>, vector<1x8x128xf32>
      %19 = vector.shape_cast %18 : vector<1x8x128xf32> to vector<8x128xf32>
      %20 = vector.shape_cast %17 : vector<8x128xf32> to vector<1x8x128xf32>
      tpu.vector_store %arg4[%c0_13, %c0_14, %c0_15], %20 {strides = array<i32>} : memref<1x8x128xf32, #tpu.memory_space<vmem>>, vector<1x8x128xf32>,
    } else {
    }
    return
  }
  func.func @transform_0(%arg0: i32, %arg1: i32) -> (i32, i32) {
    %c1_i32 = arith.constant 1 : i32
    %0 = arith.muli %arg0, %c1_i32 : i32
    %1 = arith.addi %0, %arg1 : i32
    %c0_i32 = arith.constant 0 : i32
    %c0_i32_0 = arith.constant 0 : i32
    return %1, %c0_i32 : i32, i32
  }
  func.func @transform_1(%arg0: i32, %arg1: i32) -> (i32, i32) {
    %c1_i32 = arith.constant 1 : i32
    %0 = arith.muli %arg0, %c1_i32 : i32
    %1 = arith.addi %0, %arg1 : i32
    %c0_i32 = arith.constant 0 : i32
    %c0_i32_0 = arith.constant 0 : i32
    return %1, %c0_i32 : i32, i32
  }
  func.func @transform_2(%arg0: i32, %arg1: i32) -> (i32, i32, i32) {
    %c0_i32 = arith.constant 0 : i32
    %c0_i32_0 = arith.constant 0 : i32
    %c0_i32_1 = arith.constant 0 : i32
    return %arg0, %c0_i32, %c0_i32_0 : i32, i32, i32
  }
}

</mosaic_0001>

<bundles_post_ra>
// kernel: tpu_custom_call.1
= control target key start
LH: loop header
LB: loop body
LE: loop exit
PB: predicated region body
PF: predicated region fallthrough
CT: control target
= control target key end

     0   :  { %7 = vsyncpa [#allocation4], 0  ;;  %s223_s0 = inlined_call_operand.hbm [shape: f32[16,128], index: 0, kind: input, shape index: {}]   ;;  %s224_s1 = inlined_call_operand.hbm [shape: f32[16,128], index: 1, kind: input, shape index: {}]   ;;  %s225_s2 = inlined_call_operand.hbm [shape: f32[1,8,128], index: 2, kind: output, shape index: {}]  }
   0x1   :  { %8 = vsyncpa [#allocation7], 0 }
   0x2   :  { %9 = vsyncpa [#allocation5], 0  ;;  %s167_s9 = smov [#allocation3]   ;;  %s95_s13 = scalar_lea.hbm %s223_s0, 256 }
   0x3   :  { %s19_s10 = sshll.u32 %s167_s9, 4  ;;  %p96_p0 = scmp.ne.s32.totalorder %s223_s0, %s95_s13  ;;  %s20_s10 = int_to_ptr.vmem [resolvable:$true] %s19_s10 }
   0x4   :  { %p99_p1 = scmp.lt.u32.totalorder %s95_s13, %s223_s0 }
   0x6   :  { %p101_p2 = pnand %p99_p1, %p96_p0 }
   0x8   :  { %104 = shalt.err (!%p101_p2)
}
   0x9   :  { %s105_s18 = scalar_lea.vmem %s20_s10, 256  ;;  %p110_p4 = scmp.lt.s32.totalorder %s20_s10, %s20_s10 }
   0xa   :  { %p106_p3 = scmp.ne.s32.totalorder %s20_s10, %s105_s18  ;;  %p111_p5 = scmp.lt.s32.totalorder %s105_s18, %s105_s18 }
   0xc   :  { %p112_p6 = por %p111_p5, %p110_p4 }
   0xe   :  { %p113_p7 = pnand %p112_p6, %p106_p3 }
  0x10   :  { %116 = shalt.err (!%p113_p7)
}
  0x11   :  { %s168_s19 = smov 128   ;;  %s169_s20 = smov 8  }
  0x12   :  { %25 = dma.hbm_to_vmem [thread:$0]  %s223_s0, 256, %s20_s10, [#allocation4], %s168_s19, %s168_s19, %s169_s20  }
  0x13   :  { %s170_s23 = smov [#allocation6]   ;;  %s117_s27 = scalar_lea.hbm %s224_s1, 256 }
  0x14   :  { %s35_s24 = sshll.u32 %s170_s23, 4  ;;  %p118_p8 = scmp.ne.s32.totalorder %s224_s1, %s117_s27  ;;  %s36_s24 = int_to_ptr.vmem [resolvable:$true] %s35_s24 }
  0x15   :  { %p121_p9 = scmp.lt.u32.totalorder %s117_s27, %s224_s1 }
  0x17   :  { %p123_p10 = pnand %p121_p9, %p118_p8 }
  0x19   :  { %126 = shalt.err (!%p123_p10)
}
  0x1a   :  { %s127_s4 = scalar_lea.vmem %s36_s24, 256  ;;  %p132_p12 = scmp.lt.s32.totalorder %s36_s24, %s36_s24 }
  0x1b   :  { %p128_p11 = scmp.ne.s32.totalorder %s36_s24, %s127_s4  ;;  %p133_p13 = scmp.lt.s32.totalorder %s127_s4, %s127_s4 }
  0x1d   :  { %p134_p0 = por %p133_p13, %p132_p12 }
  0x1f   :  { %p135_p1 = pnand %p134_p0, %p128_p11 }
  0x21   :  { %138 = shalt.err (!%p135_p1)
}
  0x22   :  { %41 = dma.hbm_to_vmem [thread:$0]  %s224_s1, 256, %s36_s24, [#allocation7], %s168_s19, %s168_s19, %s169_s20  }
  0x23   :  { %161 = dma.done.wait [#allocation4], 256  }
  0x24   :  { %162 = vsyncadd [#allocation4], 4294967040 }
  0x25   :  { %163 = dma.done.wait [#allocation7], 256  }
  0x26   :  { %164 = vsyncadd [#allocation7], 4294967040  ;;  %v57_v0 = vld [vmem:[#allocation3] sm:$0xff]  ;;  %v58_v1 = vld [vmem:[#allocation3 + $0x8] sm:$0xff]  ;;  %s171_s6 = smov [#allocation8]  }
  0x27   :  { %v59_v2 = vld [vmem:[#allocation6] sm:$0xff]  ;;  %v60_v3 = vld [vmem:[#allocation6 + $0x8] sm:$0xff]  ;;  %s80_s7 = sshll.u32 %s171_s6, 4  ;;  %s81_s7 = int_to_ptr.vmem [resolvable:$true] %s80_s7 }
  0x28   :  { %v61_v4 = vsub.f32 %v57_v0, %v59_v2  ;;  %v62_v5 = vsub.f32 %v58_v1, %v60_v3  ;;  %s139_s8 = scalar_lea.vmem %s81_s7, 128  ;;  %p144_p3 = scmp.lt.s32.totalorder %s81_s7, %s81_s7 }
  0x29   :  { %p140_p2 = scmp.ne.s32.totalorder %s81_s7, %s139_s8  ;;  %p145_p4 = scmp.lt.s32.totalorder %s139_s8, %s139_s8 }
  0x2a   :  { %v63_v6 = vmul.f32 %v61_v4, %v61_v4  ;;  %v64_v7 = vmul.f32 %v62_v5, %v62_v5 }
  0x2b   :  { %p146_p5 = por %p145_p4, %p144_p3 }
  0x2c   :  { %v66_v8 = vadd.f32 %v64_v7, %v63_v6 }
  0x2d   :  { %p147_p6 = pnand %p146_p5, %p140_p2 }
  0x2e   :  { %73 = vst [vmem:[#allocation8] sm:$0xff] %v66_v8 }
  0x2f   :  { %150 = shalt.err (!%p147_p6)
}
  0x30   :  { %s151_s10 = scalar_lea.hbm %s225_s2, 128 }
  0x31   :  { %p152_p7 = scmp.ne.s32.totalorder %s225_s2, %s151_s10  ;;  %p155_p8 = scmp.lt.u32.totalorder %s151_s10, %s225_s2 }
  0x33   :  { %p157_p9 = pnand %p155_p8, %p152_p7 }
  0x35   :  { %160 = shalt.err (!%p157_p9)
}
  0x36   :  { %83 = dma.vmem_to_hbm [thread:$0]  %s81_s7, 128, %s225_s2, [#allocation5]  }
  0x37   :  { %165 = dma.done.wait [#allocation5], 128  }
  0x38   :  { %166 = vsyncadd [#allocation5], 4294967168 }
  0x39   :  { %87 = vsyncpa [#allocation4], 1 }
  0x3a   :  { %88 = vsyncpa [#allocation7], 1 }
  0x3b   :  { %89 = vsyncpa [#allocation5], 1 }

</bundles_post_ra>
